<compile_context>
chip_gen: v7x
topology: tpu7x:2x2x1
jax: 0.10.0
libtpu: 0.0.40
codegen_flags: <defaults>
</compile_context>

<pallas_src>
import math

import jax
import jax.numpy as jnp
from jax.experimental import pallas as pl
from jax.experimental.pallas import tpu as pltpu

_LANE = 128      # lane width of a vreg
_SUBLANE = 8     # sublane count of a vreg (f32)


def _round_up(n: int, m: int) -> int:
    return ((n + m - 1) // m) * m


def _vmem_capacity_bytes() -> int:
    """Physical VMEM per TensorCore; conservative fallback if query fails."""
    try:
        return int(pltpu.get_tpu_info().vmem_capacity_bytes)
    except Exception:
        return 64 << 20   # v7x-sized fallback (safe everywhere)


def _make_mlp_kernel(num_layers: int, use_final_tanh: bool, matmul_in_bf16: bool):
    """Pallas kernel for an MLP with `num_layers` Linear layers (one batch tile)."""

    def kernel(*refs):
        # refs = (x_ref, w0, b0, w1, b1, ..., w_{L-1}, b_{L-1}, o_ref)
        x_ref = refs[0]
        o_ref = refs[-1]
        h = x_ref[...]                                     # (TILE_B, in_dim) f32
        if matmul_in_bf16:
            h = h.astype(jnp.bfloat16)                     # one-time input cast
        for l in range(num_layers):
            w = refs[1 + 2 * l][...]                       # bf16 or f32, read once
            b = refs[2 + 2 * l][...]                       # (1, N) f32, implicit bcast
            h = jnp.dot(h, w, preferred_element_type=jnp.float32) + b   # MXU, f32 acc
            if l < num_layers - 1:
                h = jnp.maximum(h, 0.0)                    # ReLU (VPU)
                if matmul_in_bf16:
                    h = h.astype(jnp.bfloat16)             # fused downcast for next layer
        if use_final_tanh:
            h = jnp.tanh(h)                                # EUP, f32
        o_ref[...] = h.astype(o_ref.dtype)                 # (TILE_B, out_dim) store

    return kernel


def prepare_fc_params(weights, biases, use_bf16_matmul: bool = True):
    """Pad hidden feature dims to 128 lanes and optionally pre-cast weights to bf16.

    Call ONCE at init; the returned params are what the forward consumes.
    Input/output feature dims are left unpadded (their blocks span the full
    array dim).  Biases stay f32 (added to the f32 accumulator).
    Accepts biases shaped (out,) or (1, out).
    """
    num_layers = len(weights)
    assert len(biases) == num_layers and num_layers >= 1
    dims = [int(weights[0].shape[0])] + [int(w.shape[1]) for w in weights]
    pdims = [dims[0]] + [_round_up(d, _LANE) for d in dims[1:-1]] + [dims[-1]]
    w_dtype = jnp.bfloat16 if use_bf16_matmul else jnp.float32

    pw, pb = [], []
    for l, (w, b) in enumerate(zip(weights, biases)):
        b = jnp.reshape(b, (1, -1))
        assert w.shape == (dims[l], dims[l + 1]), "weight must be (in, out)"
        assert b.shape[1] == dims[l + 1], "bias must have out_features columns"
        wp = jnp.zeros((pdims[l], pdims[l + 1]), jnp.float32)
        wp = wp.at[: w.shape[0], : w.shape[1]].set(w).astype(w_dtype)
        bp = jnp.zeros((1, pdims[l + 1]), jnp.float32)
        bp = bp.at[:, : b.shape[1]].set(b)
        pw.append(wp)
        pb.append(bp)
    return tuple(pw), tuple(pb)


def fc_continuous_net_forward(x, params, use_final_tanh: bool = False,
                              tile_b: int | None = None):
    """Pallas implementation of FCContinuousNet.forward.

    Args:
      x: (B, input_dim) float32.
      params: output of prepare_fc_params (padded weights (in,out), biases (1,out)).
    Returns:
      (B, output_dim) float32, or (B,) if output_dim == 1 (matches squeeze(1)).
    """
    pw, pb = params
    num_layers = len(pw)
    batch, in_dim = x.shape
    assert pw[0].shape[0] == in_dim, "x feature dim must match first layer fan_in"
    out_dim = int(pw[-1].shape[1])
    matmul_in_bf16 = (pw[0].dtype == jnp.bfloat16)

    # ---- batch tiling ------------------------------------------------------
    # Big tiles amortize the ~0.35us/step overhead; keep >=2 grid steps when
    # possible so the "parallel" batch axis can use both v7x TensorCores.
    if tile_b is None:
        tile_b = min(2048, _round_up(max(batch, 1), _SUBLANE))
        if batch > _SUBLANE:
            tile_b = min(tile_b, _round_up((batch + 1) // 2, _SUBLANE))
    tile_b = max(_SUBLANE, _round_up(tile_b, _SUBLANE))
    b_pad = _round_up(batch, tile_b)
    grid_b = b_pad // tile_b

    xp = x
    if b_pad != batch:
        xp = jnp.zeros((b_pad, in_dim), x.dtype).at[:batch].set(x)

    kernel = _make_mlp_kernel(num_layers, use_final_tanh, matmul_in_bf16)

    in_specs = [pl.BlockSpec((tile_b, in_dim), lambda i: (i, 0))]
    operands = [xp]
    for wp_, bp_ in zip(pw, pb):
        # Constant block index -> weights/biases fetched once, resident across
        # all grid steps.
        in_specs.append(pl.BlockSpec(wp_.shape, lambda i: (0, 0)))
        in_specs.append(pl.BlockSpec(bp_.shape, lambda i: (0, 0)))
        operands.append(wp_)
        operands.append(bp_)

    out_spec = pl.BlockSpec((tile_b, out_dim), lambda i: (i, 0))

    # ---- scheduling hints --------------------------------------------------
    k_dims = [in_dim] + [int(w.shape[1]) for w in pw]
    flops = 2 * b_pad * sum(k_dims[l] * k_dims[l + 1] for l in range(num_layers))
    transcendentals = b_pad * out_dim if use_final_tanh else 0
    weight_bytes = sum(int(w.size) * w.dtype.itemsize + int(b.size) * b.dtype.itemsize
                       for w, b in zip(pw, pb))
    bytes_accessed = 4 * b_pad * (in_dim + out_dim) + weight_bytes
    cost = pl.CostEstimate(flops=flops, transcendentals=transcendentals,
                           bytes_accessed=bytes_accessed)

    # VMEM budget: double-buffered x/out tiles + (double-buffered) resident
    # weights + in-kernel activations + headroom; capped at 75% of physical
    # VMEM per generation (v5e/v6e ~96 MiB, v7x ~48 MiB).
    max_feat = max(k_dims)
    needed = (2 * 4 * tile_b * (in_dim + out_dim)
              + 2 * weight_bytes
              + 4 * 4 * tile_b * max_feat
              + (8 << 20))
    cap = _vmem_capacity_bytes()
    vmem_limit = int(min(max(needed, 32 << 20), (cap * 3) // 4))

    out = pl.pallas_call(
        kernel,
        out_shape=jax.ShapeDtypeStruct((b_pad, out_dim), jnp.float32),
        grid=(grid_b,),
        in_specs=in_specs,
        out_specs=out_spec,
        compiler_params=pltpu.CompilerParams(
            dimension_semantics=("parallel",),   # batch grid shards over TCs (v7x)
            vmem_limit_bytes=vmem_limit),
        cost_estimate=cost,
    )(*operands)

    if b_pad != batch:
        out = out[:batch]
    if out_dim == 1:
        out = out[:, 0]   # squeeze(1), plain-JAX glue
    return out


def init_fc_continuous_net_params(key, input_dim, output_dim, hidden_dim):
    """Mirrors PyTorch nn.Linear defaults: U(-1/sqrt(fan_in), 1/sqrt(fan_in))."""
    dims = [input_dim] + list(hidden_dim) + [output_dim]
    weights, biases = [], []
    for fan_in, fan_out in zip(dims[:-1], dims[1:]):
        key, kw, kb = jax.random.split(key, 3)
        bound = 1.0 / math.sqrt(fan_in)
        w_pt = jax.random.uniform(kw, (fan_out, fan_in), jnp.float32, -bound, bound)
        b = jax.random.uniform(kb, (1, fan_out), jnp.float32, -bound, bound)
        weights.append(jnp.transpose(w_pt))   # store (in, out)
        biases.append(b)
    return weights, biases


def _reference_forward(x, weights, biases, use_final_tanh):
    h = x
    n = len(weights)
    for l, (w, b) in enumerate(zip(weights, biases)):
        h = h @ w + b
        if l < n - 1:
            h = jnp.maximum(h, 0.0)
    if use_final_tanh:
        h = jnp.tanh(h)
    if h.shape[1] == 1:
        h = h[:, 0]
    return h


if __name__ == "__main__":
    key = jax.random.PRNGKey(0)

    batch, input_dim = 2, 16
    hidden_dim = [32, 32]

    kx, kp1, kp2, kx3, kp3 = jax.random.split(key, 5)
    x = jax.random.normal(kx, (batch, input_dim), jnp.float32)

    fwd = jax.jit(fc_continuous_net_forward,
                  static_argnames=("use_final_tanh", "tile_b"))

    # Case 1: critic-style head (output_dim=1, no tanh) -> exercises squeeze(1).
    # f32 matmul path, tight tolerance.
    w1, b1 = init_fc_continuous_net_params(kp1, input_dim, 1, hidden_dim)
    p1 = prepare_fc_params(w1, b1, use_bf16_matmul=False)
    y1 = jax.block_until_ready(fwd(x, p1, use_final_tanh=False))
    ref1 = _reference_forward(x, w1, b1, False)
    assert y1.shape == (batch,)
    assert jnp.allclose(y1, ref1, atol=1e-5, rtol=1e-5)

    # Case 2: actor-style head (output_dim=6, final tanh), f32 matmul path.
    w2, b2 = init_fc_continuous_net_params(kp2, input_dim, 6, hidden_dim)
    p2 = prepare_fc_params(w2, b2, use_bf16_matmul=False)
    y2 = jax.block_until_ready(fwd(x, p2, use_final_tanh=True))
    ref2 = _reference_forward(x, w2, b2, True)
    assert y2.shape == (batch, 6)
    assert jnp.allclose(y2, ref2, atol=1e-5, rtol=1e-5)

    # Case 3: default module dims (hidden=[400, 300]) with the default bf16 MXU
    # path and a batch large enough that the auto tile gives a 2-step grid
    # (tile_b=16, b_pad=32) -> exercises batch padding + megacore-friendly grid.
    batch3, input_dim3 = 20, 16
    x3 = jax.random.normal(kx3, (batch3, input_dim3), jnp.float32)
    w3, b3 = init_fc_continuous_net_params(kp3, input_dim3, 6, [400, 300])
    p3 = prepare_fc_params(w3, b3)   # bf16 matmul inputs, f32 accumulation
    y3 = jax.block_until_ready(fwd(x3, p3, use_final_tanh=True))
    ref3 = _reference_forward(x3, w3, b3, True)
    assert y3.shape == (batch3, 6)
    assert jnp.allclose(y3, ref3, atol=5e-2, rtol=5e-2)   # bf16 numerics

    print("KERNEL_OK")
</pallas_src>

<mosaic_0001>
module attributes {stable_mosaic.version = 11 : i64} {
  func.func @kernel(%arg0: i32, %arg1: memref<8x16xf32, #tpu.memory_space<vmem>>, %arg2: memref<16x128xf32, #tpu.memory_space<vmem>>, %arg3: memref<1x128xf32, #tpu.memory_space<vmem>>, %arg4: memref<128x128xf32, #tpu.memory_space<vmem>>, %arg5: memref<1x128xf32, #tpu.memory_space<vmem>>, %arg6: memref<128x1xf32, #tpu.memory_space<vmem>>, %arg7: memref<1x1xf32, #tpu.memory_space<vmem>>, %arg8: memref<8x1xf32, #tpu.memory_space<vmem>>) attributes {dimension_semantics = [#tpu.dimension_semantics<parallel>], iteration_bounds = array<i64: 1>, scalar_prefetch = 0 : i64, scratch_operands = 0 : i64, tpu.core_type = #tpu.core_type<tc>, window_params = [{transform_indices = @transform_0, window_bounds = array<i64: 8, 16>}, {pipeline_mode = #tpu.pipeline_mode<synchronous>, transform_indices = @transform_1, window_bounds = array<i64: 16, 128>}, {pipeline_mode = #tpu.pipeline_mode<synchronous>, transform_indices = @transform_2, window_bounds = array<i64: 1, 128>}, {pipeline_mode = #tpu.pipeline_mode<synchronous>, transform_indices = @transform_3, window_bounds = array<i64: 128, 128>}, {pipeline_mode = #tpu.pipeline_mode<synchronous>, transform_indices = @transform_4, window_bounds = array<i64: 1, 128>}, {pipeline_mode = #tpu.pipeline_mode<synchronous>, transform_indices = @transform_5, window_bounds = array<i64: 128, 1>}, {pipeline_mode = #tpu.pipeline_mode<synchronous>, transform_indices = @transform_6, window_bounds = array<i64: 1, 1>}, {transform_indices = @transform_7, window_bounds = array<i64: 8, 1>}]} {
    %c0 = arith.constant 0 : index
    %c0_0 = arith.constant 0 : index
    %0 = vector.load %arg1[%c0, %c0_0] : memref<8x16xf32, #tpu.memory_space<vmem>>, vector<8x16xf32>
    %c0_1 = arith.constant 0 : index
    %c0_2 = arith.constant 0 : index
    %1 = vector.load %arg2[%c0_1, %c0_2] : memref<16x128xf32, #tpu.memory_space<vmem>>, vector<16x128xf32>
    %c0_3 = arith.constant 0 : index
    %c0_4 = arith.constant 0 : index
    %2 = vector.load %arg3[%c0_3, %c0_4] : memref<1x128xf32, #tpu.memory_space<vmem>>, vector<1x128xf32>
    %cst = arith.constant dense<0.000000e+00> : vector<8x128xf32>
    %3 = tpu.matmul %0, %1, %cst {dimension_numbers = #tpu.dot_dimension_numbers<[1], [0], [0], [1], [0, 0, 1, 1], [], []>} : vector<8x16xf32>, vector<16x128xf32>, vector<8x128xf32> -> vector<8x128xf32>
    %4 = vector.broadcast %2 : vector<1x128xf32> to vector<8x128xf32>
    %5 = arith.addf %3, %4 : vector<8x128xf32>
    %cst_5 = arith.constant 0.000000e+00 : f32
    %6 = vector.broadcast %cst_5 : f32 to vector<8x128xf32>
    %7 = arith.maximumf %5, %6 : vector<8x128xf32>
    %c0_6 = arith.constant 0 : index
    %c0_7 = arith.constant 0 : index
    %8 = vector.load %arg4[%c0_6, %c0_7] : memref<128x128xf32, #tpu.memory_space<vmem>>, vector<128x128xf32>
    %c0_8 = arith.constant 0 : index
    %c0_9 = arith.constant 0 : index
    %9 = vector.load %arg5[%c0_8, %c0_9] : memref<1x128xf32, #tpu.memory_space<vmem>>, vector<1x128xf32>
    %cst_10 = arith.constant dense<0.000000e+00> : vector<8x128xf32>
    %10 = tpu.matmul %7, %8, %cst_10 {dimension_numbers = #tpu.dot_dimension_numbers<[1], [0], [0], [1], [0, 0, 1, 1], [], []>} : vector<8x128xf32>, vector<128x128xf32>, vector<8x128xf32> -> vector<8x128xf32>
    %11 = vector.broadcast %9 : vector<1x128xf32> to vector<8x128xf32>
    %12 = arith.addf %10, %11 : vector<8x128xf32>
    %cst_11 = arith.constant 0.000000e+00 : f32
    %13 = vector.broadcast %cst_11 : f32 to vector<8x128xf32>
    %14 = arith.maximumf %12, %13 : vector<8x128xf32>
    %c0_12 = arith.constant 0 : index
    %c0_13 = arith.constant 0 : index
    %15 = vector.load %arg6[%c0_12, %c0_13] : memref<128x1xf32, #tpu.memory_space<vmem>>, vector<128x1xf32>
    %c0_14 = arith.constant 0 : index
    %c0_15 = arith.constant 0 : index
    %16 = vector.load %arg7[%c0_14, %c0_15] : memref<1x1xf32, #tpu.memory_space<vmem>>, vector<1x1xf32>
    %cst_16 = arith.constant dense<0.000000e+00> : vector<8x1xf32>
    %17 = tpu.matmul %14, %15, %cst_16 {dimension_numbers = #tpu.dot_dimension_numbers<[1], [0], [0], [1], [0, 0, 1, 1], [], []>} : vector<8x128xf32>, vector<128x1xf32>, vector<8x1xf32> -> vector<8x1xf32>
    %18 = vector.broadcast %16 : vector<1x1xf32> to vector<8x1xf32>
    %19 = arith.addf %17, %18 : vector<8x1xf32>
    %c0_17 = arith.constant 0 : index
    %c0_18 = arith.constant 0 : index
    %20 = vector.load %arg8[%c0_17, %c0_18] : memref<8x1xf32, #tpu.memory_space<vmem>>, vector<8x1xf32>
    tpu.vector_store %arg8[%c0_17, %c0_18], %19 {strides = array<i32>} : memref<8x1xf32, #tpu.memory_space<vmem>>, vector<8x1xf32>,
    return
  }
  func.func @transform_0(%arg0: i32) -> (i32, i32) {
    %c0_i32 = arith.constant 0 : i32
    %c0_i32_0 = arith.constant 0 : i32
    return %arg0, %c0_i32 : i32, i32
  }
  func.func @transform_1(%arg0: i32) -> (i32, i32) {
    %c0_i32 = arith.constant 0 : i32
    %c0_i32_0 = arith.constant 0 : i32
    %c0_i32_1 = arith.constant 0 : i32
    return %c0_i32, %c0_i32_0 : i32, i32
  }
  func.func @transform_2(%arg0: i32) -> (i32, i32) {
    %c0_i32 = arith.constant 0 : i32
    %c0_i32_0 = arith.constant 0 : i32
    %c0_i32_1 = arith.constant 0 : i32
    return %c0_i32, %c0_i32_0 : i32, i32
  }
  func.func @transform_3(%arg0: i32) -> (i32, i32) {
    %c0_i32 = arith.constant 0 : i32
    %c0_i32_0 = arith.constant 0 : i32
    %c0_i32_1 = arith.constant 0 : i32
    return %c0_i32, %c0_i32_0 : i32, i32
  }
  func.func @transform_4(%arg0: i32) -> (i32, i32) {
    %c0_i32 = arith.constant 0 : i32
    %c0_i32_0 = arith.constant 0 : i32
    %c0_i32_1 = arith.constant 0 : i32
    return %c0_i32, %c0_i32_0 : i32, i32
  }
  func.func @transform_5(%arg0: i32) -> (i32, i32) {
    %c0_i32 = arith.constant 0 : i32
    %c0_i32_0 = arith.constant 0 : i32
    %c0_i32_1 = arith.constant 0 : i32
    return %c0_i32, %c0_i32_0 : i32, i32
  }
  func.func @transform_6(%arg0: i32) -> (i32, i32) {
    %c0_i32 = arith.constant 0 : i32
    %c0_i32_0 = arith.constant 0 : i32
    %c0_i32_1 = arith.constant 0 : i32
    return %c0_i32, %c0_i32_0 : i32, i32
  }
  func.func @transform_7(%arg0: i32) -> (i32, i32) {
    %c0_i32 = arith.constant 0 : i32
    %c0_i32_0 = arith.constant 0 : i32
    return %arg0, %c0_i32 : i32, i32
  }
}

</mosaic_0001>

<bundles_post_ra>
// kernel: fc_continuous_net_forward.1
= control target key start
LH: loop header
LB: loop body
LE: loop exit
PB: predicated region body
PF: predicated region fallthrough
CT: control target
= control target key end

     0   :  { %v478_v0 = vmov 0.0|0.0   ;;  %vm479_vm0 = vmmov 0   ;;  %v480_v3 = vmov 0.0   ;;  %vm38_vm1 = vcmask 130048   ;;  %s658_s1 = inlined_call_operand.vmem [shape: f32[16,128], index: 1, kind: input, shape index: {}]   ;;  %s659_s3 = inlined_call_operand.vmem [shape: f32[128,128], index: 3, kind: input, shape index: {}]   ;;  %s660_s0 = inlined_call_operand.vmem [shape: f32[8,16], index: 0, kind: input, shape index: {}]   ;;  %s661_s5 = inlined_call_operand.vmem [shape: f32[128,1], index: 5, kind: input, shape index: {}]   ;;  %s662_s2 = inlined_call_operand.vmem [shape: f32[1,128], index: 2, kind: input, shape index: {}]   ;;  %s663_s6 = inlined_call_operand.<no memory space> [shape: f32[1,1], index: 6, kind: input, shape index: {}]   ;;  %s664_s4 = inlined_call_operand.vmem [shape: f32[1,128], index: 4, kind: input, shape index: {}]   ;;  %s665_s7 = inlined_call_operand.vmem [shape: f32[8,1], index: 7, kind: output, shape index: {}]  }
   0x1   :  { %424 = vmatprep.subr.bf16.mxu0 %v478_v0  ;;  %v29_v1 = vld [vmem:[%s658_s1] sm:$0xff]  ;;  %v30_v2 = vld [vmem:[%s658_s1 + $0x8] sm:$0xff]  ;;  %351 = vmatprep.mubr.msk.f32.mxu0 %vm479_vm0, %v480_v3  ;;  %v115_v7 = vld [vmem:[%s659_s3 + $0x10] sm:$0xff]  ;;  %v12_v59 = vstv %s663_s6  ;;  %vm300_vm2 = vcmask 7168  }
   0x2   :  { %v425_v4 = vpack.c.bf16 %v30_v2, %v29_v1  ;;  %427 = vmatprep.subr.bf16.mxu1 %v478_v0  ;;  %v113_v5 = vld [vmem:[%s659_s3] sm:$0xff]  ;;  %v114_v6 = vld [vmem:[%s659_s3 + $0x8] sm:$0xff]  ;;  %386 = vmatprep.mubr.msk.f32.mxu1 %vm479_vm0, %v480_v3  ;;  %v116_v9 = vld [vmem:[%s659_s3 + $0x18] sm:$0xff]  ;;  %13 = vst [vmem:[#allocation2] sm:$0x1] %v12_v59 }
   0x3   :  { %v428_v8 = vpack.c.bf16 %v114_v6, %v113_v5  ;;  %v28_v10 = vld [vmem:[%s660_s0] sm:$0xff]  ;;  %v431_v11 = vpack.c.bf16 %v116_v9, %v115_v7  ;;  %v118_v13 = vld [vmem:[%s659_s3 + $0x28] sm:$0xff]  ;;  %v119_v15 = vld [vmem:[%s659_s3 + $0x30] sm:$0xff] }
   0x4   :  { %426 = vmatpush3.bf16.msra.mxu0 %v425_v4  ;;  %v117_v12 = vld [vmem:[%s659_s3 + $0x20] sm:$0xff]  ;;  %v120_v16 = vld [vmem:[%s659_s3 + $0x38] sm:$0xff]  ;;  %v122_v19 = vld [vmem:[%s659_s3 + $0x48] sm:$0xff] }
   0x5   :  { %429 = vmatpush3.bf16.msra.mxu1 %v428_v8  ;;  %451 = vmatprep.subr.bf16.mxu0 %v478_v0  ;;  %v434_v14 = vpack.c.bf16 %v118_v13, %v117_v12  ;;  %v437_v17 = vpack.c.bf16 %v120_v16, %v119_v15  ;;  %v121_v18 = vld [vmem:[%s659_s3 + $0x40] sm:$0xff]  ;;  %v123_v21 = vld [vmem:[%s659_s3 + $0x50] sm:$0xff]  ;;  %v124_v22 = vld [vmem:[%s659_s3 + $0x58] sm:$0xff] }
   0x6   :  { %430 = vmatprep.subr.bf16.mxu1 %v478_v0  ;;  %v440_v20 = vpack.c.bf16 %v122_v19, %v121_v18  ;;  %v443_v23 = vpack.c.bf16 %v124_v22, %v123_v21  ;;  %v125_v24 = vld [vmem:[%s659_s3 + $0x60] sm:$0xff]  ;;  %v126_v25 = vld [vmem:[%s659_s3 + $0x68] sm:$0xff]  ;;  %v127_v27 = vld [vmem:[%s659_s3 + $0x70] sm:$0xff] }
   0x7   :  { %352 = vmatmul.mubr.msk.f32.vlgmr.msra.gmra.mrb[0].mxu0 %vm38_vm1, %v28_v10  ;;  %v446_v26 = vpack.c.bf16 %v126_v25, %v125_v24  ;;  %v128_v28 = vld [vmem:[%s659_s3 + $0x78] sm:$0xff]  ;;  %v207_v30 = vld [vmem:[%s661_s5] sm:$0xff]  ;;  %v208_v31 = vld [vmem:[%s661_s5 + $0x8] sm:$0xff] }
   0x8   :  { %421 = vmatprep.mubr.msk.f32.mxu0 %vm479_vm0, %v480_v3  ;;  %v449_v29 = vpack.c.bf16 %v128_v28, %v127_v27  ;;  %v209_v32 = vld [vmem:[%s661_s5 + $0x10] sm:$0xff]  ;;  %v452_v33 = vpack.c.bf16 %v208_v31, %v207_v30  ;;  %v210_v34 = vld [vmem:[%s661_s5 + $0x18] sm:$0xff]  ;;  %v211_v36 = vld [vmem:[%s661_s5 + $0x20] sm:$0xff] }
   0x9   :  { %432 = vmatpush3.bf16.msra.mxu1 %v431_v11  ;;  %v455_v35 = vpack.c.bf16 %v210_v34, %v209_v32  ;;  %v212_v37 = vld [vmem:[%s661_s5 + $0x28] sm:$0xff]  ;;  %v213_v39 = vld [vmem:[%s661_s5 + $0x30] sm:$0xff]  ;;  %v214_v40 = vld [vmem:[%s661_s5 + $0x38] sm:$0xff] }
   0xa   :  { %433 = vmatprep.subr.bf16.mxu1 %v478_v0  ;;  %453 = vmatpush3.bf16.msra.mxu0 %v452_v33  ;;  %v458_v38 = vpack.c.bf16 %v212_v37, %v211_v36  ;;  %v461_v41 = vpack.c.bf16 %v214_v40, %v213_v39  ;;  %v215_v42 = vld [vmem:[%s661_s5 + $0x40] sm:$0xff]  ;;  %v216_v43 = vld [vmem:[%s661_s5 + $0x48] sm:$0xff]  ;;  %v217_v45 = vld [vmem:[%s661_s5 + $0x50] sm:$0xff] }
   0xb   :  { %454 = vmatprep.subr.bf16.mxu0 %v478_v0  ;;  %v464_v44 = vpack.c.bf16 %v216_v43, %v215_v42  ;;  %v218_v46 = vld [vmem:[%s661_s5 + $0x58] sm:$0xff]  ;;  %v219_v48 = vld [vmem:[%s661_s5 + $0x60] sm:$0xff]  ;;  %v220_v49 = vld [vmem:[%s661_s5 + $0x68] sm:$0xff] }
   0xc   :  { %v467_v47 = vpack.c.bf16 %v218_v46, %v217_v45  ;;  %v470_v50 = vpack.c.bf16 %v220_v49, %v219_v48  ;;  %v306_v51 = vld [vmem:[%s662_s2] ss:$0 sm:$0xff]  ;;  %v221_v56 = vld [vmem:[%s661_s5 + $0x70] sm:$0xff]  ;;  %v222_v57 = vld [vmem:[%s661_s5 + $0x78] sm:$0xff] }
   0xd   :  { %435 = vmatpush3.bf16.msra.mxu1 %v434_v14  ;;  %v473_v58 = vpack.c.bf16 %v222_v57, %v221_v56  ;;  %v308_v60 = vld [vmem:[%s664_s4] ss:$0 sm:$0xff] }
   0xe   :  { %436 = vmatprep.subr.bf16.mxu1 %v478_v0  ;;  %456 = vmatpush3.bf16.msra.mxu0 %v455_v35  ;;  %v309_v1 = vld [vmem:[#allocation2] ss:$0 sm:$0xff] }
   0xf   :  { %457 = vmatprep.subr.bf16.mxu0 %v478_v0 }
  0x11   :  { %438 = vmatpush3.bf16.msra.mxu1 %v437_v17 }
  0x12   :  { %439 = vmatprep.subr.bf16.mxu1 %v478_v0  ;;  %459 = vmatpush3.bf16.msra.mxu0 %v458_v38 }
  0x13   :  { %460 = vmatprep.subr.bf16.mxu0 %v478_v0 }
  0x15   :  { %441 = vmatpush3.bf16.msra.mxu1 %v440_v20 }
  0x16   :  { %442 = vmatprep.subr.bf16.mxu1 %v478_v0  ;;  %462 = vmatpush3.bf16.msra.mxu0 %v461_v41 }
  0x17   :  { %463 = vmatprep.subr.bf16.mxu0 %v478_v0 }
  0x19   :  { %444 = vmatpush3.bf16.msra.mxu1 %v443_v23 }
  0x1a   :  { %445 = vmatprep.subr.bf16.mxu1 %v478_v0  ;;  %465 = vmatpush3.bf16.msra.mxu0 %v464_v44 }
  0x1b   :  { %466 = vmatprep.subr.bf16.mxu0 %v478_v0 }
  0x1d   :  { %447 = vmatpush3.bf16.msra.mxu1 %v446_v26 }
  0x1e   :  { %448 = vmatprep.subr.bf16.mxu1 %v478_v0  ;;  %468 = vmatpush3.bf16.msra.mxu0 %v467_v47 }
  0x1f   :  { %469 = vmatprep.subr.bf16.mxu0 %v478_v0 }
  0x21   :  { %450 = vmatpush3.bf16.msra.mxu1 %v449_v29 }
  0x22   :  { %471 = vmatpush3.bf16.msra.mxu0 %v470_v50 }
  0x23   :  { %472 = vmatprep.subr.bf16.mxu0 %v478_v0 }
  0x26   :  { %474 = vmatpush3.bf16.msra.mxu0 %v473_v58 }
  0xda   :  { %v108_v52 = vpop.f32.mrb[0].mxu0 }
  0xdb   :  { %v109_v53 = vadd.f32 %v306_v51, %v108_v52  ;;  %v353_v54 = vpop.f32.mrb[1].mxu0 }
  0xdd   :  { %v112_v55 = vmax.f32 %v109_v53, 0.0 }
  0xdf   :  { %387 = vmatmul.mubr.f32.vlgmr.msra.gmra.mrb[0].mxu1 %v112_v55 }
 0x1b2   :  { %v202_v61 = vpop.f32.mrb[0].mxu1 }
 0x1b3   :  { %v203_v62 = vadd.f32 %v308_v60, %v202_v61  ;;  %v388_v63 = vpop.f32.mrb[1].mxu1 }
 0x1b5   :  { %v206_v0 = vmax.f32 %v203_v62, 0.0 }
 0x1b7   :  { %422 = vmatmul.mubr.f32.vlgmr.msra.gmra.mrb[2].mxu0 %v206_v0 }
 0x28a   :  { %v296_v2 = vpop.f32.mrb[2].mxu0 }
 0x28b   :  { %v297_v3 = vadd.f32 %v309_v1, %v296_v2  ;;  %v423_v4 = vpop.f32.mrb[3].mxu0 }
 0x28d   :  { %301 = vst.msk [vmem:[%s665_s7] sm:$0xff] %vm300_vm2, %v297_v3 }

</bundles_post_ra>
